<compile_context>
chip_gen: v6e
topology: v6e:2x2x1
jax: 0.10.0
libtpu: 0.0.40
codegen_flags: <defaults>
</compile_context>

<pallas_src>
import jax
import jax.numpy as jnp
from jax.experimental import pallas as pl
from jax.experimental.pallas import tpu as pltpu

H_DIM = 32        # opt.h_dim
IN_DIM = 2        # hide_layer
OUT_DIM = 2
BATCH = 64


def generator_mlp_kernel(z_ref, w_ref, b_ref, out_ref):
    """Feature-major MLP.

    z_ref:   (IN_DIM, B)      activations, batch on the lane axis
    w_ref:   (4, H, H)        [w1 padded (cols 0..IN_DIM-1 real), w2, w3,
                               w4 padded (rows 0..OUT_DIM-1 real)]
    b_ref:   (H, 4)           column j holds bias of layer j+1 (b4 zero-padded)
    out_ref: (OUT_DIM, B)
    """
    x = z_ref[...]                                   # (IN_DIM, B)
    w1 = w_ref[0]                                    # (H, H), only cols 0..1 real

    # Layer 1: K=2 contraction on the VPU (two broadcast FMAs across lanes).
    h = (w1[:, 0:1] * x[0:1, :]
         + w1[:, 1:2] * x[1:2, :]
         + b_ref[:, 0:1])                            # (H, B)
    h = jnp.maximum(h, 0.0)

    # Layers 2 & 3: (H,H) @ (H,B) on the MXU, f32 accumulation.
    h = jnp.dot(w_ref[1], h, preferred_element_type=jnp.float32) + b_ref[:, 1:2]
    h = jnp.maximum(h, 0.0)
    h = jnp.dot(w_ref[2], h, preferred_element_type=jnp.float32) + b_ref[:, 2:3]
    h = jnp.maximum(h, 0.0)

    # Output layer: padded (H,H) @ (H,B); only the first OUT_DIM rows are real.
    y = jnp.dot(w_ref[3], h, preferred_element_type=jnp.float32)     # (H, B)
    out_ref[...] = (y[:OUT_DIM, :] + b_ref[:OUT_DIM, 3:4]).astype(out_ref.dtype)


def pack_params(params):
    """Pack the 8 Linear params (PyTorch orientation) into 2 VMEM-friendly slabs."""
    w1, b1, w2, b2, w3, b3, w4, b4 = params
    H = w1.shape[0]                                   # h_dim

    w1p = jnp.zeros((H, H), jnp.float32).at[:, : w1.shape[1]].set(w1)   # (H,H)
    w4p = jnp.zeros((H, H), jnp.float32).at[: w4.shape[0], :].set(w4)   # (H,H)
    w_slab = jnp.stack([w1p, w2, w3, w4p], axis=0)                      # (4,H,H)

    b4p = jnp.zeros((H,), jnp.float32).at[: b4.shape[0]].set(b4)
    b_slab = jnp.stack([b1, b2, b3, b4p], axis=1)                       # (H,4)
    return w_slab, b_slab


def generator_forward(z, packed):
    """z: (B, IN_DIM) -> (B, OUT_DIM).  `packed` comes from pack_params()."""
    w_slab, b_slab = packed
    B = z.shape[0]

    # Whole arrays as single VMEM blocks — no grid, no pipelining overhead.
    vmem = pl.BlockSpec(memory_space=pltpu.MemorySpace.VMEM)

    out_t = pl.pallas_call(
        generator_mlp_kernel,
        out_shape=jax.ShapeDtypeStruct((OUT_DIM, B), jnp.float32),
        in_specs=[vmem, vmem, vmem],
        out_specs=vmem,
    )(z.T, w_slab, b_slab)                            # kernel works feature-major
    return out_t.T                                    # back to (B, OUT_DIM)


def init_params(key):
    """PyTorch Linear default init: U(-1/sqrt(fan_in), +), w is (out, in), b is (out,)."""
    def linear(key, fan_in, fan_out):
        kw, kb = jax.random.split(key)
        bound = 1.0 / jnp.sqrt(fan_in)
        w = jax.random.uniform(kw, (fan_out, fan_in), jnp.float32, -bound, bound)
        b = jax.random.uniform(kb, (fan_out,), jnp.float32, -bound, bound)
        return w, b

    k1, k2, k3, k4 = jax.random.split(key, 4)
    w1, b1 = linear(k1, IN_DIM, H_DIM)
    w2, b2 = linear(k2, H_DIM, H_DIM)
    w3, b3 = linear(k3, H_DIM, H_DIM)
    w4, b4 = linear(k4, H_DIM, OUT_DIM)
    return (w1, b1, w2, b2, w3, b3, w4, b4)


def reference_forward(z, params):
    """Pure-JAX reference matching torch.nn.Linear semantics (y = x @ W.T + b)."""
    w1, b1, w2, b2, w3, b3, w4, b4 = params
    h = jnp.maximum(z @ w1.T + b1, 0.0)
    h = jnp.maximum(h @ w2.T + b2, 0.0)
    h = jnp.maximum(h @ w3.T + b3, 0.0)
    return h @ w4.T + b4


if __name__ == "__main__":
    key = jax.random.PRNGKey(0)
    kz, kp = jax.random.split(key)
    z = jax.random.normal(kz, (BATCH, IN_DIM), jnp.float32)
    params = init_params(kp)
    packed = pack_params(params)          # pack once; reused across calls

    out = generator_forward(z, packed)
    out = jax.block_until_ready(out)

    ref = reference_forward(z, params)
    assert out.shape == (BATCH, OUT_DIM)
    assert jnp.allclose(out, ref, atol=1e-4, rtol=1e-5)

    print("KERNEL_OK")
</pallas_src>

<mosaic_0001>
module attributes {stable_mosaic.version = 11 : i64} {
  func.func @generator_mlp_kernel(%arg0: memref<2x64xf32, #tpu.memory_space<vmem>>, %arg1: memref<4x32x32xf32, #tpu.memory_space<vmem>>, %arg2: memref<32x4xf32, #tpu.memory_space<vmem>>, %arg3: memref<2x64xf32, #tpu.memory_space<vmem>>) attributes {dimension_semantics = [], scalar_prefetch = 0 : i64, scratch_operands = 0 : i64, tpu.core_type = #tpu.core_type<tc>} {
    %c0 = arith.constant 0 : index
    %c0_0 = arith.constant 0 : index
    %0 = vector.load %arg0[%c0, %c0_0] : memref<2x64xf32, #tpu.memory_space<vmem>>, vector<2x64xf32>
    %c0_1 = arith.constant 0 : index
    %c0_2 = arith.constant 0 : index
    %c0_3 = arith.constant 0 : index
    %1 = vector.load %arg1[%c0_1, %c0_2, %c0_3] : memref<4x32x32xf32, #tpu.memory_space<vmem>>, vector<1x32x32xf32>
    %2 = vector.shape_cast %1 : vector<1x32x32xf32> to vector<32x32xf32>
    %3 = vector.extract_strided_slice %2 {offsets = [0, 0], sizes = [32, 1], strides = [1, 1]} : vector<32x32xf32> to vector<32x1xf32>
    %4 = vector.extract_strided_slice %0 {offsets = [0, 0], sizes = [1, 64], strides = [1, 1]} : vector<2x64xf32> to vector<1x64xf32>
    %5 = vector.broadcast %3 : vector<32x1xf32> to vector<32x64xf32>
    %6 = vector.broadcast %4 : vector<1x64xf32> to vector<32x64xf32>
    %7 = arith.mulf %5, %6 : vector<32x64xf32>
    %8 = vector.extract_strided_slice %2 {offsets = [0, 1], sizes = [32, 1], strides = [1, 1]} : vector<32x32xf32> to vector<32x1xf32>
    %9 = vector.extract_strided_slice %0 {offsets = [1, 0], sizes = [1, 64], strides = [1, 1]} : vector<2x64xf32> to vector<1x64xf32>
    %10 = vector.broadcast %8 : vector<32x1xf32> to vector<32x64xf32>
    %11 = vector.broadcast %9 : vector<1x64xf32> to vector<32x64xf32>
    %12 = arith.mulf %10, %11 : vector<32x64xf32>
    %13 = arith.addf %7, %12 : vector<32x64xf32>
    %c0_4 = arith.constant 0 : index
    %c0_5 = arith.constant 0 : index
    %14 = vector.load %arg2[%c0_4, %c0_5] : memref<32x4xf32, #tpu.memory_space<vmem>>, vector<32x1xf32>
    %15 = vector.broadcast %14 : vector<32x1xf32> to vector<32x64xf32>
    %16 = arith.addf %13, %15 : vector<32x64xf32>
    %cst = arith.constant 0.000000e+00 : f32
    %17 = vector.broadcast %cst : f32 to vector<32x64xf32>
    %18 = arith.maximumf %16, %17 : vector<32x64xf32>
    %c1 = arith.constant 1 : index
    %c0_6 = arith.constant 0 : index
    %c0_7 = arith.constant 0 : index
    %19 = vector.load %arg1[%c1, %c0_6, %c0_7] : memref<4x32x32xf32, #tpu.memory_space<vmem>>, vector<1x32x32xf32>
    %20 = vector.shape_cast %19 : vector<1x32x32xf32> to vector<32x32xf32>
    %cst_8 = arith.constant dense<0.000000e+00> : vector<32x64xf32>
    %21 = tpu.matmul %20, %18, %cst_8 {dimension_numbers = #tpu.dot_dimension_numbers<[1], [0], [0], [1], [0, 0, 1, 1], [], []>} : vector<32x32xf32>, vector<32x64xf32>, vector<32x64xf32> -> vector<32x64xf32>
    %c0_9 = arith.constant 0 : index
    %c1_10 = arith.constant 1 : index
    %22 = vector.load %arg2[%c0_9, %c1_10] : memref<32x4xf32, #tpu.memory_space<vmem>>, vector<32x1xf32>
    %23 = vector.broadcast %22 : vector<32x1xf32> to vector<32x64xf32>
    %24 = arith.addf %21, %23 : vector<32x64xf32>
    %cst_11 = arith.constant 0.000000e+00 : f32
    %25 = vector.broadcast %cst_11 : f32 to vector<32x64xf32>
    %26 = arith.maximumf %24, %25 : vector<32x64xf32>
    %c2 = arith.constant 2 : index
    %c0_12 = arith.constant 0 : index
    %c0_13 = arith.constant 0 : index
    %27 = vector.load %arg1[%c2, %c0_12, %c0_13] : memref<4x32x32xf32, #tpu.memory_space<vmem>>, vector<1x32x32xf32>
    %28 = vector.shape_cast %27 : vector<1x32x32xf32> to vector<32x32xf32>
    %cst_14 = arith.constant dense<0.000000e+00> : vector<32x64xf32>
    %29 = tpu.matmul %28, %26, %cst_14 {dimension_numbers = #tpu.dot_dimension_numbers<[1], [0], [0], [1], [0, 0, 1, 1], [], []>} : vector<32x32xf32>, vector<32x64xf32>, vector<32x64xf32> -> vector<32x64xf32>
    %c0_15 = arith.constant 0 : index
    %c2_16 = arith.constant 2 : index
    %30 = vector.load %arg2[%c0_15, %c2_16] : memref<32x4xf32, #tpu.memory_space<vmem>>, vector<32x1xf32>
    %31 = vector.broadcast %30 : vector<32x1xf32> to vector<32x64xf32>
    %32 = arith.addf %29, %31 : vector<32x64xf32>
    %cst_17 = arith.constant 0.000000e+00 : f32
    %33 = vector.broadcast %cst_17 : f32 to vector<32x64xf32>
    %34 = arith.maximumf %32, %33 : vector<32x64xf32>
    %c3 = arith.constant 3 : index
    %c0_18 = arith.constant 0 : index
    %c0_19 = arith.constant 0 : index
    %35 = vector.load %arg1[%c3, %c0_18, %c0_19] : memref<4x32x32xf32, #tpu.memory_space<vmem>>, vector<1x32x32xf32>
    %36 = vector.shape_cast %35 : vector<1x32x32xf32> to vector<32x32xf32>
    %cst_20 = arith.constant dense<0.000000e+00> : vector<32x64xf32>
    %37 = tpu.matmul %36, %34, %cst_20 {dimension_numbers = #tpu.dot_dimension_numbers<[1], [0], [0], [1], [0, 0, 1, 1], [], []>} : vector<32x32xf32>, vector<32x64xf32>, vector<32x64xf32> -> vector<32x64xf32>
    %38 = vector.extract_strided_slice %37 {offsets = [0, 0], sizes = [2, 64], strides = [1, 1]} : vector<32x64xf32> to vector<2x64xf32>
    %c0_21 = arith.constant 0 : index
    %c3_22 = arith.constant 3 : index
    %39 = vector.load %arg2[%c0_21, %c3_22] : memref<32x4xf32, #tpu.memory_space<vmem>>, vector<2x1xf32>
    %40 = vector.broadcast %39 : vector<2x1xf32> to vector<2x64xf32>
    %41 = arith.addf %38, %40 : vector<2x64xf32>
    %c0_23 = arith.constant 0 : index
    %c0_24 = arith.constant 0 : index
    %42 = vector.load %arg3[%c0_23, %c0_24] : memref<2x64xf32, #tpu.memory_space<vmem>>, vector<2x64xf32>
    tpu.vector_store %arg3[%c0_23, %c0_24], %41 {strides = array<i32>} : memref<2x64xf32, #tpu.memory_space<vmem>>, vector<2x64xf32>,
    return
  }
}

</mosaic_0001>

<bundles_post_ra>
// kernel: tpu_custom_call.1
= control target key start
LH: loop header
LB: loop body
LE: loop exit
PB: predicated region body
PF: predicated region fallthrough
CT: control target
= control target key end

     0   :  { %8 = vsyncpa [#allocation3], 0  ;;  %s724_s0 = inlined_call_operand.vmem [shape: f32[2,64], index: 0, kind: input, shape index: {}]   ;;  %s725_s1 = inlined_call_operand.hbm [shape: f32[4,32,32], index: 1, kind: input, shape index: {}]   ;;  %s726_s2 = inlined_call_operand.vmem [shape: f32[32,4], index: 2, kind: input, shape index: {}]   ;;  %s727_s3 = inlined_call_operand.hbm [shape: f32[2,64], index: 3, kind: output, shape index: {}]  }
   0x1   :  { %9 = vsyncpa [#allocation4], 0  ;;  %s640_s12 = smov [#allocation2]  }
   0x2   :  { %s17_s13 = sshll.u32 %s640_s12, 4  ;;  %s18_s13 = int_to_ptr.vmem [resolvable:$true] %s17_s13 }
   0x3   :  { %s604_s14 = scalar_lea.vmem %s18_s13, 2048  ;;  %p609_p1 = scmp.lt.s32.totalorder %s18_s13, %s18_s13 }
   0x4   :  { %p605_p0 = scmp.ne.s32.totalorder %s18_s13, %s604_s14  ;;  %p610_p2 = scmp.lt.s32.totalorder %s604_s14, %s604_s14 }
   0x6   :  { %p611_p3 = por %p610_p2, %p609_p1 }
   0x8   :  { %p612_p4 = pnand %p611_p3, %p605_p0 }
   0xa   :  { %615 = shalt.err (!%p612_p4)
}
   0xb   :  { %s641_s15 = smov 128   ;;  %s642_s16 = smov 8  }
   0xc   :  { %23 = dma.hbm_to_vmem [thread:$0]  %s725_s1, 2048, %s18_s13, [#allocation3], %s641_s15, %s641_s15, %s642_s16  }
   0xd   :  { %636 = dma.done.wait [#allocation3], 2048  }
   0xe   :  { %637 = vsyncadd [#allocation3], 4294965248  ;;  %v643_v0 = vmov 1   ;;  %v644_v1 = vmov 0   ;;  %v33_v2 = vld [vmem:[#allocation2 + $0x18] sm:$0xff]  ;;  %v32_v3 = vld [vmem:[#allocation2 + $0x10] sm:$0xff]  ;;  %v54_v11 = vlaneseq }
   0xf   :  { %584 = vset.pattern.permute.xlu0 %v643_v0  ;;  %585 = vset.pattern.permute.xlu1 %v644_v1  ;;  %v31_v4 = vld [vmem:[#allocation2 + $0x8] sm:$0xff]  ;;  %v30_v5 = vld [vmem:[#allocation2] sm:$0xff]  ;;  %v674_v6 = vld [vmem:[%s726_s2 + $0x18] sm:$0xff]  ;;  %vm143_vm0 = vcmask 261120   ;;  %v645_v54 = vmov 2   ;;  %vm473_vm1 = vcmask 517120  }
  0x10   :  { %75 = vperm.xlu0 %584, %v33_v2   ;;  %46 = vperm.xlu1 %585, %v32_v3   ;;  %v680_v7 = vld [vmem:[%s726_s2 + $0x8] sm:$0xff]  ;;  %v686_v8 = vld [vmem:[%s726_s2 + $0x10] sm:$0xff]  ;;  %v693_v9 = vld [vmem:[%s726_s2] sm:$0xff]  ;;  %v55_v12 = vshrl.u32 %v54_v11, 7 }
  0x11   :  { %v123_v10 = vld [vmem:[#allocation2 + $0x20] sm:$0xff]  ;;  %v124_v50 = vld [vmem:[#allocation2 + $0x28] sm:$0xff]  ;;  %v125_v51 = vld [vmem:[#allocation2 + $0x30] sm:$0xff] }
  0x12   :  { %534 = vmatprep.mubr.msk.f32.mxu0 %vm143_vm0, %v123_v10  ;;  %v80_v15 = vsub.s32 1, %v55_v12  ;;  %v56_v16 = vsub.s32 0, %v55_v12  ;;  %v29_v18 = vld [vmem:[%s724_s0] sm:$0x3]  ;;  %v126_v52 = vld [vmem:[#allocation2 + $0x38] sm:$0xff]  ;;  %v370_v11 = vld [vmem:[#allocation2 + $0x70] sm:$0xff] }
  0x13   :  { %v246_v53 = vld [vmem:[#allocation2 + $0x40] sm:$0xff] }
  0x14   :  { %586 = vset.pattern.permute.xlu1 %v643_v0  ;;  %67 = vperm.xlu0 %584, %v31_v4   ;;  %v81_v20 = vrot.slane %v29_v18, %v80_v15  ;;  %v57_v21 = vrot.slane %v29_v18, %v56_v16  ;;  %v368_v10 = vld [vmem:[#allocation2 + $0x60] sm:$0xff] }
  0x15   :  { %71 = vperm.xlu1 %586, %v32_v3   ;;  %548 = vmatprep.mubr.msk.f32.mxu1 %vm143_vm0, %v246_v53  ;;  %v466_v12 = vld [vmem:[%s726_s2] sm:$0x3]  ;;  %s647_s2 = smov [#allocation5]  }
  0x16   :  { %s481_s29 = sshll.u32 %s647_s2, 4  ;;  %s482_s29 = int_to_ptr.vmem [resolvable:$true] %s481_s29 }
  0x17   :  { %s616_s30 = scalar_lea.vmem %s482_s29, 32  ;;  %p621_p6 = scmp.lt.s32.totalorder %s482_s29, %s482_s29 }
  0x18   :  { %588 = vset.pattern.permute.xlu0 %v644_v1  ;;  %p617_p5 = scmp.ne.s32.totalorder %s482_s29, %s616_s30  ;;  %p622_p7 = scmp.lt.s32.totalorder %s616_s30, %s616_s30 }
  0x19   :  { %587 = vset.pattern.permute.xlu1 %v644_v1  ;;  %51 = vperm.xlu0 %588, %v33_v2  }
  0x1a   :  { %41 = vperm.xlu1 %587, %v31_v4   ;;  %p623_p8 = por %p622_p7, %p621_p6 }
  0x1c   :  { %p624_p9 = pnand %p623_p8, %p617_p5 }
  0x1d   :  { %36 = vperm.xlu0 %588, %v30_v5  }
  0x1e   :  { %111 = vperm.xlu1 %587, %v674_v6  }
  0x21   :  { %101 = vperm.xlu0 %588, %v680_v7  }
  0x22   :  { %589 = vset.pattern.permute.xlu1 %v643_v0 }
  0x23   :  { %63 = vperm.xlu1 %589, %v30_v5  }
  0x25   :  { %591 = vset.pattern.permute.xlu0 %v643_v0 }
  0x26   :  { %140 = vperm.xlu0 %591, %v674_v6  }
  0x27   :  { %590 = vset.pattern.permute.xlu1 %v644_v1 }
  0x28   :  { %106 = vperm.xlu1 %590, %v686_v8  }
  0x2a   :  { %128 = vperm.xlu0 %591, %v693_v9  }
  0x2c   :  { %96 = vperm.xlu1 %590, %v693_v9  }
  0x2e   :  { %594 = vset.pattern.permute.xlu0 %v645_v54 }
  0x2f   :  { %259 = vperm.xlu0 %594, %v686_v8  }
  0x30   :  { %592 = vset.pattern.permute.xlu1 %v643_v0 }
  0x31   :  { %136 = vperm.xlu1 %592, %v686_v8   ;;  %v248_v8 = vld [vmem:[#allocation2 + $0x50] sm:$0xff] }
  0x35   :  { %132 = vperm.xlu1 %592, %v680_v7  }
  0x39   :  { %593 = vset.pattern.permute.xlu1 %v645_v54 }
  0x3a   :  { %263 = vperm.xlu1 %593, %v674_v6  }
  0x3e   :  { %255 = vperm.xlu1 %593, %v680_v7   ;;  %v247_v7 = vld [vmem:[#allocation2 + $0x48] sm:$0xff] }
  0x42   :  { %251 = vperm.xlu1 %593, %v693_v9   ;;  %v249_v9 = vld [vmem:[#allocation2 + $0x58] sm:$0xff] }
  0x8b   :  { %v47_v13 = vpop.permute.xlu1 %46  ;;  %v76_v14 = vpop.permute.xlu0 %75 }
  0x8c   :  { %v85_v22 = vmul.f32 %v81_v20, %v76_v14  ;;  %v60_v35 = vmul.f32 %v57_v21, %v47_v13  ;;  %v646_v13 = vmov 3  }
  0x8d   :  { %595 = vset.pattern.permute.xlu0 %v646_v13 }
  0x8e   :  { %469 = vperm.xlu0 %595, %v466_v12  }
  0x8f   :  { %v68_v17 = vpop.permute.xlu0 %67 }
  0x90   :  { %v72_v19 = vpop.permute.xlu1 %71  ;;  %v83_v32 = vmul.f32 %v81_v20, %v68_v17 }
  0x91   :  { %v84_v31 = vmul.f32 %v81_v20, %v72_v19 }
  0x93   :  { %v88_v40 = vadd.f32 %v84_v31, %v60_v35  ;;  %v371_v31 = vld [vmem:[#allocation2 + $0x78] sm:$0xff] }
  0x94   :  { %v52_v23 = vpop.permute.xlu0 %51 }
  0x95   :  { %v61_v24 = vmul.f32 %v57_v21, %v52_v23  ;;  %v42_v25 = vpop.permute.xlu1 %41 }
  0x96   :  { %v59_v33 = vmul.f32 %v57_v21, %v42_v25 }
  0x97   :  { %v89_v26 = vadd.f32 %v85_v22, %v61_v24 }
  0x98   :  { %v37_v29 = vpop.permute.xlu0 %36  ;;  %v87_v38 = vadd.f32 %v83_v32, %v59_v33 }
  0x99   :  { %v112_v27 = vpop.permute.xlu1 %111  ;;  %v58_v37 = vmul.f32 %v57_v21, %v37_v29 }
  0x9a   :  { %v117_v28 = vadd.f32 %v112_v27, %v89_v26 }
  0x9c   :  { %v121_v30 = vmax.f32 %v117_v28, 0.0  ;;  %v102_v36 = vpop.permute.xlu0 %101 }
  0x9d   :  { %v115_v42 = vadd.f32 %v102_v36, %v87_v38 }
  0x9e   :  { %v64_v34 = vpop.permute.xlu1 %63  ;;  %526 = vmatprep.subr.mxu0 %v121_v30 }
  0x9f   :  { %527 = vmatpush3.msra.mxu0 %v121_v30  ;;  %v82_v39 = vmul.f32 %v81_v20, %v64_v34  ;;  %v119_v47 = vmax.f32 %v115_v42, 0.0  ;;  %v369_v30 = vld [vmem:[#allocation2 + $0x68] sm:$0xff] }
  0xa1   :  { %v86_v45 = vadd.f32 %v82_v39, %v58_v37  ;;  %v141_v56 = vpop.permute.xlu0 %140 }
  0xa3   :  { %v107_v41 = vpop.permute.xlu1 %106 }
  0xa4   :  { %v116_v43 = vadd.f32 %v107_v41, %v88_v40 }
  0xa5   :  { %v129_v62 = vpop.permute.xlu0 %128 }
  0xa6   :  { %v120_v44 = vmax.f32 %v116_v43, 0.0 }
  0xa7   :  { %v97_v46 = vpop.permute.xlu1 %96 }
  0xa8   :  { %v114_v48 = vadd.f32 %v97_v46, %v86_v45  ;;  %528 = vmatprep.subr.mxu0 %v120_v44 }
  0xa9   :  { %529 = vmatpush3.msra.mxu0 %v120_v44 }
  0xaa   :  { %v118_v49 = vmax.f32 %v114_v48, 0.0  ;;  %530 = vmatprep.subr.mxu0 %v119_v47  ;;  %v260_v19 = vpop.permute.xlu0 %259 }
  0xab   :  { %531 = vmatpush3.msra.mxu0 %v119_v47 }
  0xac   :  { %532 = vmatprep.subr.mxu0 %v118_v49  ;;  %v137_v55 = vpop.permute.xlu1 %136 }
  0xad   :  { %533 = vmatpush3.msra.mxu0 %v118_v49 }
  0xae   :  { %535 = vmatmul.mubr.msk.f32.vlgmr.msra.gmra.mxu0 %vm143_vm0, %v124_v50 }
  0xaf   :  { %537 = vmatprep.mubr.msk.f32.mxu0 %vm143_vm0, %v125_v51 }
  0xb0   :  { %v133_v59 = vpop.permute.xlu1 %132 }
  0xb2   :  { %538 = vmatmul.mubr.msk.f32.gmra.mxu0 %vm143_vm0, %v126_v52 }
  0xb3   :  { %562 = vmatprep.mubr.msk.f32.mxu0 %vm143_vm0, %v368_v10 }
  0xb5   :  { %v264_v14 = vpop.permute.xlu1 %263 }
  0xb9   :  { %v256_v15 = vpop.permute.xlu1 %255 }
  0xbd   :  { %v252_v21 = vpop.permute.xlu1 %251 }
 0x109   :  { %v470_v32 = vpop.permute.xlu0 %469 }
 0x16e   :  { %v536_v57 = vpop.f32.mrf.mxu0 }
 0x16f   :  { %v228_v0 = vadd.f32 %v536_v57, %v133_v59 }
 0x170   :  { %v222_v58 = vpop.f32.mrf.mxu0 }
 0x171   :  { %v223_v3 = vadd.f32 %v222_v58, %v129_v62  ;;  %v242_v5 = vmax.f32 %v228_v0, 0.0 }
 0x172   :  { %v539_v60 = vpop.f32.mrf.mxu0 }
 0x173   :  { %v238_v61 = vadd.f32 %v539_v60, %v141_v56  ;;  %v241_v6 = vmax.f32 %v223_v3, 0.0 }
 0x174   :  { %v232_v63 = vpop.f32.mrf.mxu0 }
 0x175   :  { %v244_v1 = vmax.f32 %v238_v61, 0.0  ;;  %v233_v2 = vadd.f32 %v232_v63, %v137_v55 }
 0x177   :  { %v243_v4 = vmax.f32 %v233_v2, 0.0  ;;  %540 = vmatprep.subr.mxu1 %v244_v1 }
 0x178   :  { %541 = vmatpush3.msra.mxu1 %v244_v1 }
 0x179   :  { %542 = vmatprep.subr.mxu1 %v243_v4 }
 0x17a   :  { %543 = vmatpush3.msra.mxu1 %v243_v4 }
 0x17b   :  { %544 = vmatprep.subr.mxu1 %v242_v5 }
 0x17c   :  { %545 = vmatpush3.msra.mxu1 %v242_v5 }
 0x17d   :  { %546 = vmatprep.subr.mxu1 %v241_v6 }
 0x17e   :  { %547 = vmatpush3.msra.mxu1 %v241_v6 }
 0x17f   :  { %549 = vmatmul.mubr.msk.f32.vlgmr.msra.gmra.mxu1 %vm143_vm0, %v247_v7 }
 0x180   :  { %551 = vmatprep.mubr.msk.f32.mxu1 %vm143_vm0, %v248_v8 }
 0x183   :  { %552 = vmatmul.mubr.msk.f32.gmra.mxu1 %vm143_vm0, %v249_v9 }
 0x184   :  { %565 = vmatprep.mubr.msk.f32.mxu1 %vm143_vm0, %v370_v11 }
 0x23f   :  { %v550_v16 = vpop.f32.mrf.mxu1 }
 0x240   :  { %v350_v23 = vadd.f32 %v550_v16, %v256_v15 }
 0x241   :  { %v344_v17 = vpop.f32.mrf.mxu1 }
 0x242   :  { %v345_v26 = vadd.f32 %v344_v17, %v252_v21  ;;  %v364_v28 = vmax.f32 %v350_v23, 0.0 }
 0x243   :  { %v553_v18 = vpop.f32.mrf.mxu1 }
 0x244   :  { %v360_v20 = vadd.f32 %v553_v18, %v264_v14  ;;  %v363_v29 = vmax.f32 %v345_v26, 0.0 }
 0x245   :  { %v354_v22 = vpop.f32.mrf.mxu1 }
 0x246   :  { %v366_v24 = vmax.f32 %v360_v20, 0.0  ;;  %v355_v25 = vadd.f32 %v354_v22, %v260_v19 }
 0x248   :  { %v365_v27 = vmax.f32 %v355_v25, 0.0  ;;  %554 = vmatprep.subr.mxu0 %v366_v24  ;;  %568 = vmatprep.subr.mxu1 %v366_v24 }
 0x249   :  { %555 = vmatpush3.msra.mxu0 %v366_v24  ;;  %572 = vmatpush3.msra.mxu1 %v366_v24 }
 0x24a   :  { %556 = vmatprep.subr.mxu0 %v365_v27  ;;  %569 = vmatprep.subr.mxu1 %v365_v27 }
 0x24b   :  { %557 = vmatpush3.msra.mxu0 %v365_v27  ;;  %573 = vmatpush3.msra.mxu1 %v365_v27 }
 0x24c   :  { %558 = vmatprep.subr.mxu0 %v364_v28  ;;  %570 = vmatprep.subr.mxu1 %v364_v28 }
 0x24d   :  { %559 = vmatpush3.msra.mxu0 %v364_v28  ;;  %574 = vmatpush3.msra.mxu1 %v364_v28 }
 0x24e   :  { %560 = vmatprep.subr.mxu0 %v363_v29  ;;  %571 = vmatprep.subr.mxu1 %v363_v29 }
 0x24f   :  { %561 = vmatpush3.msra.mxu0 %v363_v29  ;;  %575 = vmatpush3.msra.mxu1 %v363_v29 }
 0x250   :  { %563 = vmatmul.mubr.msk.f32.vlgmr.msra.gmra.mxu0 %vm143_vm0, %v369_v30  ;;  %566 = vmatmul.mubr.msk.f32.vlgmr.msra.gmra.mxu1 %vm143_vm0, %v371_v31 }
 0x310   :  { %v564_v33 = vpop.f32.mrf.mxu0  ;;  %v567_v34 = vpop.f32.mrf.mxu1 }
 0x312   :  { %v450_v35 = vpop.f32.mrf.mxu0  ;;  %v459_v36 = vpop.f32.mrf.mxu1 }
 0x313   :  { %v472_v37 = vadd.f32 %v470_v32, %v450_v35 }
 0x315   :  { %474 = vst.msk [vmem:[#allocation5] sm:$0x3] %vm473_vm1, %v472_v37 }
 0x316   :  { %627 = shalt.err (!%p624_p9)
}
 0x317   :  { %484 = dma.vmem_to_hbm [thread:$0]  %s482_s29, 32, %s727_s3, [#allocation4]  }
 0x318   :  { %638 = dma.done.wait [#allocation4], 32  }
 0x319   :  { %639 = vsyncadd [#allocation4], 4294967264 }
 0x31a   :  { %488 = vsyncpa [#allocation3], 1 }
 0x31b   :  { %489 = vsyncpa [#allocation4], 1 }

</bundles_post_ra>
